<compile_context>
chip_gen: v5e
topology: v5e:2x2
jax: 0.10.0
libtpu: 0.0.40
codegen_flags: <defaults>
</compile_context>

<pallas_src>
import functools

import jax
import jax.numpy as jnp
from jax.experimental import pallas as pl
from jax.experimental.pallas import tpu as pltpu


_FILL_CHUNK = 128   # time steps transposed into the scratch per (unrolled) step


def _coalescence_kernel(x_ref, o_ref, xt_ref, *, window_size, stride, input_dim,
                        seq_len, frames_per_tile, frame_chunk, num_chunks,
                        scratch_rows):
    """One (batch, frame-tile) grid step.

    x_ref : (D, T)       torch-layout input for this batch element (VMEM block)
    o_ref : (W*D, TF)    torch-layout output tile (frames on lanes)
    xt_ref: (T_scr, D)   scratch: transposed input, zero-padded past T
    """
    D, W, T = input_dim, window_size, seq_len
    TF, TS, NS = frames_per_tile, frame_chunk, num_chunks
    T_scr = scratch_rows

    j = pl.program_id(1)

    # ---- once per batch element: scratch = transpose(input); zero the tail ----
    @pl.when(j == 0)
    def _fill_scratch():
        n_full = T // _FILL_CHUNK
        for c in range(n_full):
            lo = c * _FILL_CHUNK
            xt_ref[lo:lo + _FILL_CHUNK, :] = x_ref[:, lo:lo + _FILL_CHUNK].T
        if T % _FILL_CHUNK:
            lo = n_full * _FILL_CHUNK
            xt_ref[lo:T, :] = x_ref[:, lo:T].T
        # Rows [T, T_scr) are zero so partial (cut) windows read zeros,
        # matching the torch zero-filled last window.  No OOB reads anywhere.
        zlo = T
        while zlo < T_scr:
            zhi = min(zlo + _FILL_CHUNK, T_scr)
            xt_ref[zlo:zhi, :] = jnp.zeros((zhi - zlo, D), dtype=xt_ref.dtype)
            zlo = zhi

    # ---- output tile: o[w*D + d, f_local] = xt[(j*TF + f_local)*stride + w, d] ----
    t0 = j * (TF * stride)
    if (TF * stride) % 128 == 0:
        t0 = pl.multiple_of(t0, 128)
    for w in range(W):
        for s in range(NS):
            start = t0 + s * (TS * stride) + w
            win = xt_ref[pl.ds(start, TS, stride=stride), :]         # (TS, D)
            o_ref[w * D:(w + 1) * D, s * TS:(s + 1) * TS] = win.T    # (D, TS)


def coalescence(x, input_lengths, *, window_size, stride):
    """x: (B, input_dim, T).  Returns ((B, window_size*input_dim, F), ceil-div lengths)."""
    B, D, T = x.shape
    W = window_size
    F = pl.cdiv(T, stride)
    WD = W * D

    # Frame tiling: frames are the lane axis of the output; keep tiles
    # 128-aligned (unmasked stores), unless the whole output fits in one
    # sub-128 tile (full-extent exception of the (8,128) rule).
    if F <= 128:
        TF = F
    else:
        TF = min(512, 128 * pl.cdiv(F, 128))
    NJ = pl.cdiv(F, TF)
    TS = min(128, TF)          # frames per inner chunk (keeps transposes vreg-friendly)
    NS = TF // TS              # exact by construction
    # Scratch rows cover every (frame, window-offset) read of the padded
    # frame grid, so no read is ever out of bounds.
    T_scr = NJ * TF * stride + W

    kernel = functools.partial(
        _coalescence_kernel,
        window_size=W, stride=stride, input_dim=D, seq_len=T,
        frames_per_tile=TF, frame_chunk=TS, num_chunks=NS, scratch_rows=T_scr)

    out = pl.pallas_call(
        kernel,
        out_shape=jax.ShapeDtypeStruct((B, WD, F), x.dtype),
        grid_spec=pltpu.PrefetchScalarGridSpec(
            num_scalar_prefetch=0,
            grid=(B, NJ),
            # Input stays in torch layout; constant block index along j means
            # it is DMA'd once per batch element and reused across frame tiles.
            in_specs=[pl.BlockSpec((None, D, T), lambda b, j: (b, 0, 0))],
            out_specs=pl.BlockSpec((None, WD, TF), lambda b, j: (b, 0, j)),
            scratch_shapes=[pltpu.VMEM((T_scr, D), x.dtype)],
        ),
        compiler_params=pltpu.CompilerParams(
            # Batch axis -> megacore.  The frame-tile axis must stay in-order
            # ("arbitrary") because later tiles reuse the scratch filled at j==0.
            dimension_semantics=("parallel", "arbitrary"),
            vmem_limit_bytes=48 * 1024 * 1024,
        ),
    )(x)

    out_lengths = None
    if input_lengths is not None:
        # torch does .long(); JAX default integer width is 32-bit.
        out_lengths = ((input_lengths + stride - 1) // stride).astype(jnp.int32)
    return out, out_lengths


def _reference(x, input_lengths, *, window_size, stride):
    """Vectorized pure-JAX transcription of the PyTorch forward (for validation)."""
    B, D, T = x.shape
    F = -(-T // stride)
    pad = max(0, (F - 1) * stride + window_size - T)
    xt = jnp.pad(jnp.transpose(x, (0, 2, 1)), ((0, 0), (0, pad), (0, 0)))
    idx = jnp.arange(F)[:, None] * stride + jnp.arange(window_size)[None, :]   # (F, W)
    win = xt[:, idx, :]                                                        # (B, F, W, D)
    out = win.reshape(B, F, window_size * D).transpose(0, 2, 1)                # (B, W*D, F)
    lens = None
    if input_lengths is not None:
        lens = ((input_lengths + stride - 1) // stride).astype(jnp.int32)
    return out, lens


if __name__ == "__main__":
    def _check(B, D, T, window_size, stride, tag):
        key = jax.random.fold_in(jax.random.PRNGKey(0), tag)
        kx, kl = jax.random.split(key)
        x = jax.random.normal(kx, (B, D, T), dtype=jnp.float32)       # (B, C, T) as in torch
        lengths = jax.random.randint(kl, (B,), 1, T + 1, dtype=jnp.int32)

        out, out_lens = coalescence(x, lengths, window_size=window_size, stride=stride)
        out = jax.block_until_ready(out)
        out_lens = jax.block_until_ready(out_lens)

        ref_out, ref_lens = _reference(x, lengths, window_size=window_size, stride=stride)
        F = -(-T // stride)
        assert out.shape == (B, window_size * D, F), (out.shape, tag)
        assert jnp.allclose(out, ref_out, atol=1e-6, rtol=1e-6), ("mismatch", tag)
        assert jnp.array_equal(out_lens, ref_lens), ("lengths", tag)

    # canonical small case (matches the torch module's typical use)
    _check(B=2, D=16, T=12, window_size=3, stride=2, tag=0)
    # odd sizes: D not a multiple of 8, T not a multiple of the stride
    _check(B=2, D=10, T=23, window_size=4, stride=3, tag=1)
    # multi-tile path: F > 512 frames -> two 512-frame output tiles per batch element
    _check(B=2, D=16, T=1200, window_size=3, stride=2, tag=2)

    print("KERNEL_OK")
</pallas_src>

<mosaic_0001>
module attributes {stable_mosaic.version = 11 : i64} {
  func.func @_coalescence_kernel(%arg0: i32, %arg1: i32, %arg2: memref<1x16x12xf32, #tpu.memory_space<vmem>>, %arg3: memref<1x48x6xf32, #tpu.memory_space<vmem>>, %arg4: memref<15x16xf32, #tpu.memory_space<vmem>>) attributes {dimension_semantics = [#tpu.dimension_semantics<parallel>, #tpu.dimension_semantics<arbitrary>], iteration_bounds = array<i64: 2, 1>, scalar_prefetch = 0 : i64, scratch_operands = 1 : i64, tpu.core_type = #tpu.core_type<tc>, window_params = [{transform_indices = @transform_0, window_bounds = array<i64: 1, 16, 12>}, {transform_indices = @transform_1, window_bounds = array<i64: 1, 48, 6>}]} {
    %c0_i32 = arith.constant 0 : i32
    %0 = arith.cmpi eq, %arg1, %c0_i32 : i32
    %1 = arith.extui %0 : i1 to i32
    %c0_i32_0 = arith.constant 0 : i32
    %2 = arith.cmpi ne, %1, %c0_i32_0 : i32
    scf.if %2 {
      %c0_14 = arith.constant 0 : index
      %c0_15 = arith.constant 0 : index
      %c0_16 = arith.constant 0 : index
      %28 = vector.load %arg2[%c0_14, %c0_15, %c0_16] : memref<1x16x12xf32, #tpu.memory_space<vmem>>, vector<1x16x12xf32>
      %29 = vector.shape_cast %28 : vector<1x16x12xf32> to vector<16x12xf32>
      %30 = tpu.transpose %29, [1, 0] : vector<16x12xf32> -> vector<12x16xf32>
      %c0_17 = arith.constant 0 : index
      %c0_18 = arith.constant 0 : index
      %31 = vector.load %arg4[%c0_17, %c0_18] : memref<15x16xf32, #tpu.memory_space<vmem>>, vector<12x16xf32>
      tpu.vector_store %arg4[%c0_17, %c0_18], %30 {strides = array<i32>} : memref<15x16xf32, #tpu.memory_space<vmem>>, vector<12x16xf32>,
      %cst = arith.constant 0.000000e+00 : f32
      %32 = vector.broadcast %cst : f32 to vector<3x16xf32>
      %c12 = arith.constant 12 : index
      %c0_19 = arith.constant 0 : index
      %33 = vector.load %arg4[%c12, %c0_19] : memref<15x16xf32, #tpu.memory_space<vmem>>, vector<3x16xf32>
      tpu.vector_store %arg4[%c12, %c0_19], %32 {strides = array<i32>} : memref<15x16xf32, #tpu.memory_space<vmem>>, vector<3x16xf32>,
    } else {
    }
    %c12_i32 = arith.constant 12 : i32
    %3 = arith.muli %arg1, %c12_i32 : i32
    %c0_i32_1 = arith.constant 0 : i32
    %4 = arith.addi %3, %c0_i32_1 : i32
    %c0_i32_2 = arith.constant 0 : i32
    %5 = arith.addi %4, %c0_i32_2 : i32
    %6 = arith.index_cast %5 : i32 to index
    %c0 = arith.constant 0 : index
    %7 = tpu.strided_load %arg4[%6, %c0] {strides = array<i32: 2, 1>} : memref<15x16xf32, #tpu.memory_space<vmem>>, vector<6x16xf32>
    %8 = tpu.transpose %7, [1, 0] : vector<6x16xf32> -> vector<16x6xf32>
    %c0_3 = arith.constant 0 : index
    %c0_4 = arith.constant 0 : index
    %c0_5 = arith.constant 0 : index
    %9 = vector.load %arg3[%c0_3, %c0_4, %c0_5] : memref<1x48x6xf32, #tpu.memory_space<vmem>>, vector<1x16x6xf32>
    %10 = vector.shape_cast %9 : vector<1x16x6xf32> to vector<16x6xf32>
    %11 = vector.shape_cast %8 : vector<16x6xf32> to vector<1x16x6xf32>
    tpu.vector_store %arg3[%c0_3, %c0_4, %c0_5], %11 {strides = array<i32>} : memref<1x48x6xf32, #tpu.memory_space<vmem>>, vector<1x16x6xf32>,
    %c0_i32_6 = arith.constant 0 : i32
    %12 = arith.addi %3, %c0_i32_6 : i32
    %c1_i32 = arith.constant 1 : i32
    %13 = arith.addi %12, %c1_i32 : i32
    %14 = arith.index_cast %13 : i32 to index
    %c0_7 = arith.constant 0 : index
    %15 = tpu.strided_load %arg4[%14, %c0_7] {strides = array<i32: 2, 1>} : memref<15x16xf32, #tpu.memory_space<vmem>>, vector<6x16xf32>
    %16 = tpu.transpose %15, [1, 0] : vector<6x16xf32> -> vector<16x6xf32>
    %c0_8 = arith.constant 0 : index
    %c16 = arith.constant 16 : index
    %c0_9 = arith.constant 0 : index
    %17 = vector.load %arg3[%c0_8, %c16, %c0_9] : memref<1x48x6xf32, #tpu.memory_space<vmem>>, vector<1x16x6xf32>
    %18 = vector.shape_cast %17 : vector<1x16x6xf32> to vector<16x6xf32>
    %19 = vector.shape_cast %16 : vector<16x6xf32> to vector<1x16x6xf32>
    tpu.vector_store %arg3[%c0_8, %c16, %c0_9], %19 {strides = array<i32>} : memref<1x48x6xf32, #tpu.memory_space<vmem>>, vector<1x16x6xf32>,
    %c0_i32_10 = arith.constant 0 : i32
    %20 = arith.addi %3, %c0_i32_10 : i32
    %c2_i32 = arith.constant 2 : i32
    %21 = arith.addi %20, %c2_i32 : i32
    %22 = arith.index_cast %21 : i32 to index
    %c0_11 = arith.constant 0 : index
    %23 = tpu.strided_load %arg4[%22, %c0_11] {strides = array<i32: 2, 1>} : memref<15x16xf32, #tpu.memory_space<vmem>>, vector<6x16xf32>
    %24 = tpu.transpose %23, [1, 0] : vector<6x16xf32> -> vector<16x6xf32>
    %c0_12 = arith.constant 0 : index
    %c32 = arith.constant 32 : index
    %c0_13 = arith.constant 0 : index
    %25 = vector.load %arg3[%c0_12, %c32, %c0_13] : memref<1x48x6xf32, #tpu.memory_space<vmem>>, vector<1x16x6xf32>
    %26 = vector.shape_cast %25 : vector<1x16x6xf32> to vector<16x6xf32>
    %27 = vector.shape_cast %24 : vector<16x6xf32> to vector<1x16x6xf32>
    tpu.vector_store %arg3[%c0_12, %c32, %c0_13], %27 {strides = array<i32>} : memref<1x48x6xf32, #tpu.memory_space<vmem>>, vector<1x16x6xf32>,
    return
  }
  func.func @transform_0(%arg0: i32, %arg1: i32) -> (i32, i32, i32) {
    %c0_i32 = arith.constant 0 : i32
    %c0_i32_0 = arith.constant 0 : i32
    %c0_i32_1 = arith.constant 0 : i32
    return %arg0, %c0_i32, %c0_i32_0 : i32, i32, i32
  }
  func.func @transform_1(%arg0: i32, %arg1: i32) -> (i32, i32, i32) {
    %c0_i32 = arith.constant 0 : i32
    %c0_i32_0 = arith.constant 0 : i32
    return %arg0, %c0_i32, %arg1 : i32, i32, i32
  }
}

</mosaic_0001>

<bundles_post_ra>
// kernel: tpu_custom_call.1
= control target key start
LH: loop header
LB: loop body
LE: loop exit
PB: predicated region body
PF: predicated region fallthrough
CT: control target
= control target key end

     0   :  { %s452_s6 = smov 0   ;;  %s454_s7 = smov 0   ;;  %s485_s0 = inlined_call_operand.vmem [shape: f32[2,16,12], index: 0, kind: input, shape index: {}]   ;;  %s486_s1 = inlined_call_operand.vmem [shape: f32[2,48,6], index: 1, kind: output, shape index: {}]  }
   0x1   :  { %s456_s8 = smov 0  }
   0x2 LB: > { %s23_s9 = sadd.s32 1, %s435_s7  ;;  %p382_p0 = scmp.ge.s32.totalorder %s439_s8, 1  ;;  %s439_s8 = sphi %s456_s8, %s11_s8   ;;  %s435_s7 = sphi %s454_s7, %s488_s7   ;;  %s431_s6 = sphi %s452_s6, %s487_s6  }
   0x3   : > { %p25_p1 = scmp.ge.s32.totalorder %s23_s9, 2  ;;  %p101_p2 = scmp.lt.s32.totalorder %s439_s8, 3 }
   0x5   : > { %s490_s9 = smov (%p25_p1, %s23_s9), 0  ;;  %p102_p3 = pnand %p382_p0, %p101_p2 }
   0x6   : > { %p124_p4 = scmp.lt.s32.totalorder (!%p102_p3), %s431_s6, 1 }
   0x7   : > { %105 = sbr.rel (%p102_p3) target bundleno = 388 (0x184), region = 24 }
   0xc   : > { %s492_s6 = smov (!%p124_p4, %s431_s6), 1  ;;  %vm179_vm0 = vcmask 124928   ;;  %v441_v2 = vmov 0.0   ;;  %vm175_vm1 = vcmask 130048   ;;  %vm177_vm2 = vcmask 125952  }
   0xd   : > { %s390_s10 = sshll.u32 %s492_s6, 4  ;;  %180 = vst.msk [vmem:[#allocation2 + $0xc] sm:$0x7] %vm179_vm0, %v441_v2  ;;  %s391_s14 = smul.u32 48, %s492_s6  ;;  %vm216_vm3 = vcmask 48128  }
   0xe   : > { %s128_s13 = scalar_lea.vmem %s485_s0, %s390_s10 }
   0xf   : > { %v141_v0 = vld [vmem:[%s128_s13] sm:$0xff]  ;;  %v142_v1 = vld [vmem:[%s128_s13 + $0x8] sm:$0xff]  ;;  %s136_s17 = scalar_lea.vmem %s486_s1, %s391_s14 }
  0x10   : > { %143 = vxpose.xlu0.b32.start [1/2] (short) (narrow) %v141_v0, 16 }
  0x18   : > { %144 = vxpose.xlu0.b32.end [2/2] (short) (narrow) %v142_v1, 16 }
  0xb4   : > { %v159_v3 = vpop.trf.xlu0 }
  0xb5   : > { %176 = vst.msk [vmem:[#allocation2] sm:$0xff] %vm175_vm1, %v159_v3 }
  0xbc   : > { %v160_v4 = vpop.trf.xlu0 }
  0xbd   : > { %178 = vst.msk [vmem:[#allocation2 + $0x8] sm:$0xf] %vm177_vm2, %v160_v4 }
  0xc4   : > { %v387_v5 = vld [vmem:[#allocation2 + $0x2] ss:$2 sm:$0x3f]  ;;  %v386_v7 = vld [vmem:[#allocation2 + $0x1] ss:$2 sm:$0x3f] }
  0xc5   : > { %v183_v6 = vld [vmem:[#allocation2] ss:$2 sm:$0x3f]  ;;  %259 = vxpose.xlu2.b32.start.end [1/1] (short) (narrow) %v387_v5, 16 }
  0xc6   : > { %184 = vxpose.xlu1.b32.start.end [1/1] (short) (narrow) %v183_v6, 16 }
  0xd6   : > { %222 = vxpose.xlu1.b32.start.end [1/1] (short) (narrow) %v386_v7, 16 }
 0x15e   : > { %v275_v8 = vpop.trf.xlu2 }
 0x15f   : > { %291 = vst.msk [vmem:[%s136_s17 + $0x20] sm:$0xff] %vm216_vm3, %v275_v8 }
 0x166   : > { %v276_v9 = vpop.trf.xlu2 }
 0x167   : > { %292 = vst.msk [vmem:[%s136_s17 + $0x28] sm:$0xff] %vm216_vm3, %v276_v9 }
 0x16a   : > { %v200_v10 = vpop.trf.xlu1 }
 0x16b   : > { %217 = vst.msk [vmem:[%s136_s17] sm:$0xff] %vm216_vm3, %v200_v10 }
 0x172   : > { %v201_v11 = vpop.trf.xlu1 }
 0x173   : > { %218 = vst.msk [vmem:[%s136_s17 + $0x8] sm:$0xff] %vm216_vm3, %v201_v11 }
 0x17a   : > { %v238_v12 = vpop.trf.xlu1 }
 0x17b   : > { %254 = vst.msk [vmem:[%s136_s17 + $0x10] sm:$0xff] %vm216_vm3, %v238_v12 }
 0x182   : > { %v239_v13 = vpop.trf.xlu1 }
 0x183   : > { %255 = vst.msk [vmem:[%s136_s17 + $0x18] sm:$0xff] %vm216_vm3, %v239_v13 }
 0x184 PF: > { %s11_s8 = sadd.s32 1, %s439_s8   ;;  %s487_s6 = smov %s435_s7 }
 0x185   : > { %p8_p5 = scmp.ge.s32.totalorder %s11_s8, 4   ;;  %s488_s7 = smov %s490_s9 }
 0x187   :  { %10 = sbr.rel (!%p8_p5) target bundleno = 2 (0x2), region = 61 }

</bundles_post_ra>
